<compile_context>
chip_gen: v7x
topology: tpu7x:2x2x1
jax: 0.10.0
libtpu: 0.0.40
codegen_flags: <defaults>
</compile_context>

<pallas_src>
import jax
import jax.numpy as jnp
from jax.experimental import pallas as pl
from jax.experimental.pallas import tpu as pltpu

LANES = 128


def _fused_stats_kernel(rec_ref, img_ref,
                        sr_ref, sm_ref, srr_ref, smm_ref, srm_ref):
    # rec_ref / img_ref: (tile_rows, 128) VMEM blocks.
    # s*_ref: (1, 128) per-tile lane-dense partial statistics.
    r = rec_ref[...].astype(jnp.float32)
    m = img_ref[...].astype(jnp.float32)
    sr_ref[...] = jnp.sum(r, axis=0, keepdims=True)
    sm_ref[...] = jnp.sum(m, axis=0, keepdims=True)
    srr_ref[...] = jnp.sum(r * r, axis=0, keepdims=True)
    smm_ref[...] = jnp.sum(m * m, axis=0, keepdims=True)
    srm_ref[...] = jnp.sum(r * m, axis=0, keepdims=True)


def _layout_2d(x, padded_rows):
    """Flatten to (padded_rows, 128); pads only if strictly necessary."""
    x_flat = x.reshape(-1)
    n = x_flat.shape[0]
    padded = padded_rows * LANES
    if padded != n:
        x_flat = jnp.pad(x_flat, (0, padded - n))
    return x_flat.reshape(padded_rows, LANES)


def zyn_loss(rec_amp_slm, image_amp_slm, max_tile_rows=4096):
    """Matches torch ZYNLoss.forward: returns (loss_val, coefficient_temp)."""
    assert rec_amp_slm.shape == image_amp_slm.shape
    n_elems = int(rec_amp_slm.size)

    # ---- balanced lane-dense (rows, 128) layout, tile_rows a multiple of 8 ----
    rows = -(-n_elems // LANES)                       # cdiv(n, 128)
    min_tiles = 2 if rows >= 16 else 1                # keep both v7x TCs busy
    num_tiles = max(min_tiles, -(-rows // max_tile_rows))
    tile_rows = ((-(-rows // num_tiles) + 7) // 8) * 8
    num_tiles = -(-rows // tile_rows)
    padded_rows = num_tiles * tile_rows
    padded_elems = padded_rows * LANES

    rec2d = _layout_2d(rec_amp_slm, padded_rows)
    img2d = _layout_2d(image_amp_slm, padded_rows)
    itemsize = jnp.dtype(rec2d.dtype).itemsize

    in_block = lambda: pl.BlockSpec((tile_rows, LANES), lambda i: (i, 0))
    out_block = lambda: pl.BlockSpec((1, LANES), lambda i: (0, i))
    partial_shape = jax.ShapeDtypeStruct((1, num_tiles * LANES), jnp.float32)

    cparams = pltpu.CompilerParams(
        dimension_semantics=("parallel",),
        vmem_limit_bytes=32 * 1024 * 1024,
    )

    # ---- single fused pass: five per-tile partial statistics ----
    sr_p, sm_p, srr_p, smm_p, srm_p = pl.pallas_call(
        _fused_stats_kernel,
        out_shape=(partial_shape,) * 5,
        grid=(num_tiles,),
        in_specs=[in_block(), in_block()],
        out_specs=tuple(out_block() for _ in range(5)),
        compiler_params=cparams,
        cost_estimate=pl.CostEstimate(
            flops=8 * padded_elems,
            transcendentals=0,
            bytes_accessed=2 * padded_elems * itemsize
            + 5 * num_tiles * LANES * 4,
        ),
    )(rec2d, img2d)

    # ---- tiny scalar epilogue in XLA ----
    s_r = jnp.sum(sr_p)
    s_m = jnp.sum(sm_p)
    s_rr = jnp.sum(srr_p)
    s_mm = jnp.sum(smm_p)
    s_rm = jnp.sum(srm_p)

    coeff = s_m / s_r
    # Zero padding contributes 0 to every statistic, so dividing by the true
    # element count gives the exact MSE.  (Expanded quadratic form; partials
    # are f32 -- see correctness note about near-converged reconstructions.)
    sse = coeff * coeff * s_rr - 2.0 * coeff * s_rm + s_mm
    sse = jnp.maximum(sse, 0.0)          # guard tiny negative from cancellation
    mse = (255.0 * 255.0) * sse / n_elems
    loss = mse + coeff ** 10
    return loss, coeff


def _reference_zyn_loss(rec, img):
    coeff = jnp.sum(img) / jnp.sum(rec)
    diff = coeff * rec * 255.0 - img * 255.0
    loss = jnp.mean(diff * diff) + coeff ** 10
    return loss, coeff


if __name__ == "__main__":
    key = jax.random.PRNGKey(0)
    k1, k2 = jax.random.split(key)
    N, C, H, W = 2, 4, 16, 16

    # Amplitudes are non-negative; keep rec away from zero so the coefficient
    # (and coeff**10) stays well-conditioned, like a real SLM amplitude field.
    rec_amp_slm = jax.random.uniform(
        k1, (N, C, H, W), dtype=jnp.float32, minval=0.05, maxval=1.0)
    image_amp_slm = jax.random.uniform(
        k2, (N, C, H, W), dtype=jnp.float32, minval=0.0, maxval=1.0)

    loss, coeff = zyn_loss(rec_amp_slm, image_amp_slm)
    loss, coeff = jax.block_until_ready((loss, coeff))

    ref_loss, ref_coeff = _reference_zyn_loss(rec_amp_slm, image_amp_slm)
    assert jnp.allclose(coeff, ref_coeff, rtol=1e-5, atol=1e-5), (coeff, ref_coeff)
    assert jnp.allclose(loss, ref_loss, rtol=1e-4, atol=1e-4), (loss, ref_loss)

    print("KERNEL_OK")
</pallas_src>

<mosaic_0001>
module attributes {stable_mosaic.version = 11 : i64} {
  func.func @_fused_stats_kernel(%arg0: i32, %arg1: memref<8x128xf32, #tpu.memory_space<vmem>>, %arg2: memref<8x128xf32, #tpu.memory_space<vmem>>, %arg3: memref<1x128xf32, #tpu.memory_space<vmem>>, %arg4: memref<1x128xf32, #tpu.memory_space<vmem>>, %arg5: memref<1x128xf32, #tpu.memory_space<vmem>>, %arg6: memref<1x128xf32, #tpu.memory_space<vmem>>, %arg7: memref<1x128xf32, #tpu.memory_space<vmem>>) attributes {dimension_semantics = [#tpu.dimension_semantics<parallel>], iteration_bounds = array<i64: 2>, scalar_prefetch = 0 : i64, scratch_operands = 0 : i64, tpu.core_type = #tpu.core_type<tc>, window_params = [{transform_indices = @transform_0, window_bounds = array<i64: 8, 128>}, {transform_indices = @transform_1, window_bounds = array<i64: 8, 128>}, {transform_indices = @transform_2, window_bounds = array<i64: 1, 128>}, {transform_indices = @transform_3, window_bounds = array<i64: 1, 128>}, {transform_indices = @transform_4, window_bounds = array<i64: 1, 128>}, {transform_indices = @transform_5, window_bounds = array<i64: 1, 128>}, {transform_indices = @transform_6, window_bounds = array<i64: 1, 128>}]} {
    %c0 = arith.constant 0 : index
    %c0_0 = arith.constant 0 : index
    %0 = vector.load %arg1[%c0, %c0_0] : memref<8x128xf32, #tpu.memory_space<vmem>>, vector<8x128xf32>
    %c0_1 = arith.constant 0 : index
    %c0_2 = arith.constant 0 : index
    %1 = vector.load %arg2[%c0_1, %c0_2] : memref<8x128xf32, #tpu.memory_space<vmem>>, vector<8x128xf32>
    %cst = arith.constant dense<0.000000e+00> : vector<128xf32>
    %2 = vector.multi_reduction <add>, %0, %cst [0] : vector<8x128xf32> to vector<128xf32>
    %3 = vector.shape_cast %2 : vector<128xf32> to vector<1x128xf32>
    %c0_3 = arith.constant 0 : index
    %c0_4 = arith.constant 0 : index
    %4 = vector.load %arg3[%c0_3, %c0_4] : memref<1x128xf32, #tpu.memory_space<vmem>>, vector<1x128xf32>
    tpu.vector_store %arg3[%c0_3, %c0_4], %3 {strides = array<i32>} : memref<1x128xf32, #tpu.memory_space<vmem>>, vector<1x128xf32>,
    %cst_5 = arith.constant dense<0.000000e+00> : vector<128xf32>
    %5 = vector.multi_reduction <add>, %1, %cst_5 [0] : vector<8x128xf32> to vector<128xf32>
    %6 = vector.shape_cast %5 : vector<128xf32> to vector<1x128xf32>
    %c0_6 = arith.constant 0 : index
    %c0_7 = arith.constant 0 : index
    %7 = vector.load %arg4[%c0_6, %c0_7] : memref<1x128xf32, #tpu.memory_space<vmem>>, vector<1x128xf32>
    tpu.vector_store %arg4[%c0_6, %c0_7], %6 {strides = array<i32>} : memref<1x128xf32, #tpu.memory_space<vmem>>, vector<1x128xf32>,
    %8 = arith.mulf %0, %0 : vector<8x128xf32>
    %cst_8 = arith.constant dense<0.000000e+00> : vector<128xf32>
    %9 = vector.multi_reduction <add>, %8, %cst_8 [0] : vector<8x128xf32> to vector<128xf32>
    %10 = vector.shape_cast %9 : vector<128xf32> to vector<1x128xf32>
    %c0_9 = arith.constant 0 : index
    %c0_10 = arith.constant 0 : index
    %11 = vector.load %arg5[%c0_9, %c0_10] : memref<1x128xf32, #tpu.memory_space<vmem>>, vector<1x128xf32>
    tpu.vector_store %arg5[%c0_9, %c0_10], %10 {strides = array<i32>} : memref<1x128xf32, #tpu.memory_space<vmem>>, vector<1x128xf32>,
    %12 = arith.mulf %1, %1 : vector<8x128xf32>
    %cst_11 = arith.constant dense<0.000000e+00> : vector<128xf32>
    %13 = vector.multi_reduction <add>, %12, %cst_11 [0] : vector<8x128xf32> to vector<128xf32>
    %14 = vector.shape_cast %13 : vector<128xf32> to vector<1x128xf32>
    %c0_12 = arith.constant 0 : index
    %c0_13 = arith.constant 0 : index
    %15 = vector.load %arg6[%c0_12, %c0_13] : memref<1x128xf32, #tpu.memory_space<vmem>>, vector<1x128xf32>
    tpu.vector_store %arg6[%c0_12, %c0_13], %14 {strides = array<i32>} : memref<1x128xf32, #tpu.memory_space<vmem>>, vector<1x128xf32>,
    %16 = arith.mulf %0, %1 : vector<8x128xf32>
    %cst_14 = arith.constant dense<0.000000e+00> : vector<128xf32>
    %17 = vector.multi_reduction <add>, %16, %cst_14 [0] : vector<8x128xf32> to vector<128xf32>
    %18 = vector.shape_cast %17 : vector<128xf32> to vector<1x128xf32>
    %c0_15 = arith.constant 0 : index
    %c0_16 = arith.constant 0 : index
    %19 = vector.load %arg7[%c0_15, %c0_16] : memref<1x128xf32, #tpu.memory_space<vmem>>, vector<1x128xf32>
    tpu.vector_store %arg7[%c0_15, %c0_16], %18 {strides = array<i32>} : memref<1x128xf32, #tpu.memory_space<vmem>>, vector<1x128xf32>,
    return
  }
  func.func @transform_0(%arg0: i32) -> (i32, i32) {
    %c0_i32 = arith.constant 0 : i32
    %c0_i32_0 = arith.constant 0 : i32
    return %arg0, %c0_i32 : i32, i32
  }
  func.func @transform_1(%arg0: i32) -> (i32, i32) {
    %c0_i32 = arith.constant 0 : i32
    %c0_i32_0 = arith.constant 0 : i32
    return %arg0, %c0_i32 : i32, i32
  }
  func.func @transform_2(%arg0: i32) -> (i32, i32) {
    %c0_i32 = arith.constant 0 : i32
    %c0_i32_0 = arith.constant 0 : i32
    return %c0_i32, %arg0 : i32, i32
  }
  func.func @transform_3(%arg0: i32) -> (i32, i32) {
    %c0_i32 = arith.constant 0 : i32
    %c0_i32_0 = arith.constant 0 : i32
    return %c0_i32, %arg0 : i32, i32
  }
  func.func @transform_4(%arg0: i32) -> (i32, i32) {
    %c0_i32 = arith.constant 0 : i32
    %c0_i32_0 = arith.constant 0 : i32
    return %c0_i32, %arg0 : i32, i32
  }
  func.func @transform_5(%arg0: i32) -> (i32, i32) {
    %c0_i32 = arith.constant 0 : i32
    %c0_i32_0 = arith.constant 0 : i32
    return %c0_i32, %arg0 : i32, i32
  }
  func.func @transform_6(%arg0: i32) -> (i32, i32) {
    %c0_i32 = arith.constant 0 : i32
    %c0_i32_0 = arith.constant 0 : i32
    return %c0_i32, %arg0 : i32, i32
  }
}

</mosaic_0001>

<bundles_post_ra>
// kernel: tpu_custom_call.1
= control target key start
LH: loop header
LB: loop body
LE: loop exit
PB: predicated region body
PF: predicated region fallthrough
CT: control target
= control target key end

     0   :  { %s1395_s0 = inlined_call_operand.hbm [shape: f32[16,128], index: 0, kind: input, shape index: {}]   ;;  %s1396_s1 = inlined_call_operand.hbm [shape: f32[16,128], index: 1, kind: input, shape index: {}]   ;;  %s1397_s2 = inlined_call_operand.hbm [shape: f32[1,256], index: 2, kind: output, shape index: {0}]   ;;  %s1398_s3 = inlined_call_operand.hbm [shape: f32[1,256], index: 3, kind: output, shape index: {1}]   ;;  %s1399_s4 = inlined_call_operand.hbm [shape: f32[1,256], index: 4, kind: output, shape index: {2}]   ;;  %s1400_s5 = inlined_call_operand.hbm [shape: f32[1,256], index: 5, kind: output, shape index: {3}]   ;;  %s1401_s6 = inlined_call_operand.hbm [shape: f32[1,256], index: 6, kind: output, shape index: {4}]  }
   0x1   :  { %1414 = sst [smem:[#allocation23_spill]] %s1395_s0 }
   0x2   :  { %1415 = sst [smem:[#allocation24_spill]] %s1396_s1 }
   0x3   :  { %12 = vsyncpa [#allocation3], 0 }
   0x4   :  { %14 = vsyncpa [#allocation3 + $0x1], 0 }
   0x5   :  { %15 = vsyncpa [#allocation6], 0 }
   0x6   :  { %17 = vsyncpa [#allocation6 + $0x1], 0 }
   0x7   :  { %18 = vsyncpa [#allocation4], 0 }
   0x8   :  { %20 = vsyncpa [#allocation4 + $0x1], 0 }
   0x9   :  { %21 = vsyncpa [#allocation9], 0 }
   0xa   :  { %23 = vsyncpa [#allocation9 + $0x1], 0 }
   0xb   :  { %24 = vsyncpa [#allocation12], 0 }
   0xc   :  { %26 = vsyncpa [#allocation12 + $0x1], 0  ;;  %s1032_s21 = smov 0   ;;  %s1034_s22 = smov 0  }
   0xd   :  { %s1036_s23 = smov 0   ;;  %s1038_s24 = smov 0  }
   0xe LB: > { %1416 = sst [smem:[#allocation19_spill]] %s980_s22  ;;  %s1053_s25 = sadd.s32 4294967295, %s988_s24   ;;  %s988_s24 = sphi %s1038_s24, %s1443_s24   ;;  %s984_s23 = sphi %s1036_s23, %s1446_s23   ;;  %s980_s22 = sphi %s1034_s22, %s1445_s22   ;;  %s976_s21 = sphi %s1032_s21, %s1444_s21  }
   0xf   : > { %1417 = sst [smem:[#allocation20_spill]] %s984_s23  ;;  %s1402_s26 = sadd.s32 4294967294, %s988_s24  }
  0x10   : > { %s1057_s27 = sadd.s32 1, %s988_s24   ;;  %s39_s28 = sadd.s32 1, %s984_s23 }
  0x11   : > { %1418 = sst [smem:[#allocation21_spill]] %s1057_s27  ;;  %s36_s29 = ssub.s32 %s988_s24, %s1057_s27 }
  0x12   : > { %p46_p0 = scmp.ne.s32.totalorder %s984_s23, %s980_s22  ;;  %p37_p1 = scmp.eq.s32.totalorder %s36_s29, 0 }
  0x13   : > { %p47_p2 = scmp.eq.s32.totalorder %s988_s24, 0  ;;  %p52_p3 = scmp.ne.s32.totalorder %s980_s22, %s976_s21 }
  0x14   : > { %p53_p4 = scmp.eq.s32.totalorder %s1053_s25, 0  ;;  %p102_p7 = scmp.eq.s32.totalorder %s1053_s25, 1 }
  0x15   : > { %s1069_s30 = scalar_select %p37_p1, %s984_s23, %s39_s28  }
  0x16   : > { %p1071_p5 = por %p47_p2, %p46_p0  ;;  %p1075_p6 = por %p53_p4, %p52_p3 }
  0x17   : > { %1419 = sst [smem:[#allocation22_spill]] %s1069_s30  ;;  %p108_p8 = scmp.eq.s32.totalorder %s1402_s26, 1 }
  0x18   : > { %s1421_s8 = scalar_select %p1075_p6, 1, 0 }
  0x19   : > { %p704_p10 = scmp.lt.s32.totalorder %s988_s24, 2  ;;  %p1084_p11 = por %p102_p7, %p46_p0 }
  0x1a   : > { %p1088_p12 = por %p108_p8, %p52_p3  ;;  %s1093_s11 = sand.u32 1, %s984_s23  }
  0x1b   : > { %s1422_s9 = scalar_select %p1084_p11, 1, 0 }
  0x1c   : > { %s1423_s10 = scalar_select %p1088_p12, 1, 0 }
  0x1d   : > { %s654_s12 = sshll.u32 %s988_s24, 7  ;;  %s653_s13 = sshll.u32 %s1093_s11, 3 }
  0x1e   : > { %s1424_s0 = sld [smem:[#allocation23_spill]]  ;;  %s236_s17 = scalar_lea.vmem [#allocation2], %s653_s13 }
  0x1f   : > { %s243_s18 = sshll.u32 %s236_s17, 4  ;;  %p1108_p13 = pnand %p704_p10, %p1071_p5  ;;  %s1112_s18 = int_to_ptr.vmem [resolvable:$true] %s243_s18 }
  0x20   : > { %s233_s20 = scalar_lea.sflag [#allocation3], %s1093_s11 }
  0x21   : > { %p740_p3 = pneg %p1108_p13 }
  0x24   : > { %s1102_s16 = scalar_lea.hbm %s1424_s0, %s654_s12  ;;  %s743_s14 = scalar_lea.hbm %s1424_s0, 256 }
  0x25   : > { %s738_s28 = scalar_lea.hbm %s1102_s16, 128  ;;  %p744_p5 = scmp.lt.u32.totalorder %s1102_s16, %s1424_s0 }
  0x26   : > { %p739_p2 = scmp.ne.s32.totalorder %s1102_s16, %s738_s28  ;;  %p745_p8 = scmp.lt.u32.totalorder %s743_s14, %s738_s28 }
  0x27   : > { %p747_p9 = scmp.lt.u32.totalorder %s738_s28, %s1102_s16 }
  0x28   : > { %p741_p4 = pnand %p740_p3, %p739_p2  ;;  %p746_p10 = por %p745_p8, %p744_p5 }
  0x2a   : > { %p742_p7 = pneg %p741_p4  ;;  %p748_p0 = por %p747_p9, %p746_p10 }
  0x2c   : > { %p749_p1 = pnand %p748_p0, %p742_p7 }
  0x2e   : > { %752 = shalt.err (!%p749_p1)
}
  0x2f   : > { %s753_s26 = scalar_lea.vmem %s1112_s18, 128  ;;  %s990_s29 = smov [#allocation2]  }
  0x30   : > { %p754_p2 = scmp.ne.s32.totalorder %s1112_s18, %s753_s26  ;;  %s758_s7 = sshll.u32 %s990_s29, 4  ;;  %s759_s7 = int_to_ptr.vmem [resolvable:$false] %s758_s7 }
  0x31   : > { %s760_s15 = scalar_lea.vmem %s759_s7, 256  ;;  %p761_p11 = scmp.lt.s32.totalorder %s1112_s18, %s759_s7 }
  0x32   : > { %p756_p4 = pnand %p754_p2, %p740_p3  ;;  %p762_p5 = scmp.lt.s32.totalorder %s760_s15, %s753_s26 }
  0x34   : > { %p757_p12 = pneg %p756_p4  ;;  %p763_p8 = por %p762_p5, %p761_p11 }
  0x36   : > { %p764_p9 = pnand %p763_p8, %p757_p12 }
  0x38   : > { %767 = shalt.err (!%p764_p9)
}
  0x39   : > { %684 = dma.hbm_to_vmem [thread:$0]  (!%p1108_p13), %s1102_s16, 128, %s1112_s18, %s233_s20  }
  0x3a   : > { %p1426_p0 = scmp.lt.s32.totalorder %s988_s24, 3  ;;  %p1427_p1 = scmp.ge.s32.totalorder %s988_s24, 1 }
  0x3b   : > { %s1429_s1 = sld [smem:[#allocation24_spill]]  ;;  %s254_s29 = scalar_lea.vmem [#allocation5], %s653_s13 }
  0x3c   : > { %p1146_p7 = pnand %p1427_p1, %p1426_p0  ;;  %s261_s7 = sshll.u32 %s254_s29, 4  ;;  %s262_s7 = int_to_ptr.vmem [resolvable:$true] %s261_s7 }
  0x3d   : > { %s251_s16 = scalar_lea.sflag [#allocation6], %s1093_s11 }
  0x3e   : > { %s1428_s28 = scalar_select %p1146_p7, 1, 0 }
  0x41   : > { %s1155_s17 = scalar_lea.hbm %s1429_s1, %s654_s12  ;;  %s773_s12 = scalar_lea.hbm %s1429_s1, 256 }
  0x42   : > { %s768_s18 = scalar_lea.hbm %s1155_s17, 128  ;;  %p774_p2 = scmp.lt.u32.totalorder %s1155_s17, %s1429_s1 }
  0x43   : > { %p769_p11 = scmp.ne.s32.totalorder %s1155_s17, %s768_s18  ;;  %p775_p4 = scmp.lt.u32.totalorder %s773_s12, %s768_s18 }
  0x44   : > { %p777_p8 = scmp.lt.u32.totalorder %s768_s18, %s1155_s17 }
  0x45   : > { %p771_p12 = pnand %p769_p11, %p740_p3  ;;  %p776_p5 = por %p775_p4, %p774_p2 }
  0x47   : > { %p772_p10 = pneg %p771_p12  ;;  %p778_p9 = por %p777_p8, %p776_p5 }
  0x49   : > { %p779_p0 = pnand %p778_p9, %p772_p10 }
  0x4b   : > { %782 = shalt.err (!%p779_p0)
}
  0x4c   : > { %s783_s11 = scalar_lea.vmem %s262_s7, 128  ;;  %s991_s13 = smov [#allocation5]  }
  0x4d   : > { %p784_p1 = scmp.ne.s32.totalorder %s262_s7, %s783_s11  ;;  %s788_s29 = sshll.u32 %s991_s13, 4  ;;  %s789_s29 = int_to_ptr.vmem [resolvable:$false] %s788_s29 }
  0x4e   : > { %s790_s20 = scalar_lea.vmem %s789_s29, 256  ;;  %p791_p6 = scmp.lt.s32.totalorder %s262_s7, %s789_s29 }
  0x4f   : > { %p786_p11 = pnand %p784_p1, %p740_p3  ;;  %p792_p7 = scmp.lt.s32.totalorder %s790_s20, %s783_s11 }
  0x51   : > { %p787_p12 = pneg %p786_p11  ;;  %p793_p2 = por %p792_p7, %p791_p6 }
  0x53   : > { %p794_p4 = pnand %p793_p2, %p787_p12 }
  0x55   : > { %797 = shalt.err (!%p794_p4)
}
  0x56   : > { %687 = dma.hbm_to_vmem [thread:$0]  (!%p1108_p13), %s1155_s17, 128, %s262_s7, %s251_s16  }
  0x57   : > { %p1430_p10 = scmp.ne.s32.totalorder %s1428_s28, 0 }
  0x58   : > { %s1182_s18 = sand.u32 (!%p1430_p10), 1, %s980_s22   ;;  %p1431_p3 = scmp.ne.s32.totalorder (!%p1430_p10), %s1421_s8, 0 }
  0x59   : > { %270 = sbr.rel (%p1430_p10) target bundleno = 226 (0xe2), region = 28  ;;  %s658_s15 = sshll.u32 (!%p1430_p10), %s1182_s18, 3 }
  0x5a   : > { %s273_s12 = scalar_lea.sflag (!%p1430_p10), [#allocation3], %s1182_s18  ;;  %s276_s26 = scalar_lea.vmem (!%p1430_p10), [#allocation2], %s658_s15 }
  0x60   : > { %955 = dma.done.wait (%p1431_p3), %s273_s12, 128  }
  0x61   : > { %957 = vsyncadd (%p1431_p3), %s273_s12, 4294967168  ;;  %s282_s19 = scalar_lea.sflag [#allocation6], %s1182_s18  ;;  %s285_s17 = scalar_lea.vmem [#allocation5], %s658_s15 }
  0x62   : > { %959 = dma.done.wait (%p1431_p3), %s282_s19, 128  }
  0x63   : > { %961 = vsyncadd (%p1431_p3), %s282_s19, 4294967168  ;;  %v335_v0 = vld [vmem:[%s285_s17] sm:$0xff]  ;;  %v334_v1 = vld [vmem:[%s276_s26] sm:$0xff]  ;;  %s1409_s28 = scalar_lea.vmem [#allocation8], %s1182_s18  ;;  %s1407_s8 = scalar_lea.vmem [#allocation11], %s1182_s18 }
  0x64   : > { %v343_v2 = vrot.slane %v335_v0, 4  ;;  %v358_v3 = vmul.f32 %v335_v0, %v335_v0  ;;  %v336_v4 = vrot.slane %v334_v1, 4  ;;  %v350_v5 = vmul.f32 %v334_v1, %v334_v1  ;;  %s416_s7 = sshll.u32 %s1409_s28, 4  ;;  %s442_s16 = sshll.u32 %s1407_s8, 4  ;;  %s1201_s7 = int_to_ptr.vmem [resolvable:$true] %s416_s7  ;;  %s1214_s16 = int_to_ptr.vmem [resolvable:$true] %s442_s16 }
  0x65   : > { %v366_v6 = vmul.f32 %v335_v0, %v334_v1  ;;  %s1408_s14 = scalar_lea.vmem [#allocation7], %s1182_s18  ;;  %s1406_s13 = scalar_lea.vmem [#allocation10], %s1182_s18 }
  0x66   : > { %v344_v7 = vadd.f32 %v343_v2, %v335_v0  ;;  %v359_v8 = vrot.slane %v358_v3, 4  ;;  %v337_v9 = vadd.f32 %v336_v4, %v334_v1  ;;  %v351_v10 = vrot.slane %v350_v5, 4  ;;  %s403_s11 = sshll.u32 %s1408_s14, 4  ;;  %s429_s29 = sshll.u32 %s1406_s13, 4  ;;  %s1216_s11 = int_to_ptr.vmem [resolvable:$true] %s403_s11  ;;  %s1218_s29 = int_to_ptr.vmem [resolvable:$true] %s429_s29 }
  0x67   : > { %v367_v11 = vrot.slane %v366_v6, 4  ;;  %s1405_s15 = scalar_lea.vmem [#allocation13], %s1182_s18  ;;  %s660_s26 = sshll.u32 %s1053_s25, 4 }
  0x68   : > { %v345_v12 = vrot.slane %v344_v7, 2  ;;  %v360_v13 = vadd.f32 %v359_v8, %v358_v3  ;;  %v338_v14 = vrot.slane %v337_v9, 2  ;;  %v352_v15 = vadd.f32 %v351_v10, %v350_v5  ;;  %s455_s12 = sshll.u32 %s1405_s15, 4  ;;  %s1225_s15 = scalar_lea.hbm %s1398_s3, %s660_s26  ;;  %s1220_s12 = int_to_ptr.vmem [resolvable:$true] %s455_s12 }
  0x69   : > { %v368_v16 = vadd.f32 %v367_v11, %v366_v6  ;;  %s1230_s20 = scalar_lea.hbm %s1400_s5, %s660_s26  ;;  %s1235_s19 = scalar_lea.hbm %s1397_s2, %s660_s26 }
  0x6a   : > { %v346_v17 = vadd.f32 %v345_v12, %v344_v7  ;;  %v361_v18 = vrot.slane %v360_v13, 2  ;;  %v339_v19 = vadd.f32 %v338_v14, %v337_v9  ;;  %v353_v20 = vrot.slane %v352_v15, 2  ;;  %s1432_s17 = scalar_lea.vmem [#allocation8], %s1182_s18  ;;  %s1433_s0 = scalar_lea.vmem [#allocation7], %s1182_s18 }
  0x6b   : > { %v369_v21 = vrot.slane %v368_v16, 2  ;;  %s1244_s23 = scalar_lea.hbm %s1399_s4, %s660_s26  ;;  %s1249_s22 = scalar_lea.hbm %s1401_s6, %s660_s26 }
  0x6c   : > { %v347_v22 = vrot.slane %v346_v17, 1  ;;  %v362_v23 = vadd.f32 %v361_v18, %v360_v13  ;;  %v340_v24 = vrot.slane %v339_v19, 1  ;;  %v354_v25 = vadd.f32 %v353_v20, %v352_v15  ;;  %s1434_s28 = sand.u32 1, %s1053_s25   ;;  %p1435_p13 = scmp.ne.s32.totalorder %s1422_s9, 0 }
  0x6d   : > { %v370_v26 = vadd.f32 %v369_v21, %v368_v16  ;;  %s1253_s14 = scalar_lea.sflag [#allocation9], %s1434_s28 }
  0x6e   : > { %v348_v27 = vadd.f32 %v347_v22, %v346_v17  ;;  %v363_v28 = vrot.slane %v362_v23, 1  ;;  %v341_v29 = vadd.f32 %v340_v24, %v339_v19  ;;  %v355_v30 = vrot.slane %v354_v25, 1 }
  0x6f   : > { %v371_v31 = vrot.slane %v370_v26, 1 }
  0x70   : > { %349 = vst [vmem:[%s1432_s17] sm:$0x1] %v348_v27  ;;  %v364_v32 = vadd.f32 %v363_v28, %v362_v23  ;;  %342 = vst [vmem:[%s1433_s0] sm:$0x1] %v341_v29  ;;  %v356_v33 = vadd.f32 %v355_v30, %v354_v25  ;;  %s798_s17 = scalar_lea.vmem %s1201_s7, 16  ;;  %s992_s0 = smov [#allocation8]  }
  0x71   : > { %v372_v34 = vadd.f32 %v371_v31, %v370_v26  ;;  %p799_p6 = scmp.ne.s32.totalorder %s1201_s7, %s798_s17  ;;  %s802_s27 = sshll.u32 %s992_s0, 4  ;;  %s803_s27 = int_to_ptr.vmem [resolvable:$false] %s802_s27 }
  0x72   : > { %s804_s1 = scalar_lea.vmem %s803_s27, 32  ;;  %p805_p8 = scmp.lt.s32.totalorder %s1201_s7, %s803_s27 }
  0x73   : > { %p800_p7 = pnand %p799_p6, %p1435_p13  ;;  %p806_p9 = scmp.lt.s32.totalorder %s804_s1, %s798_s17 }
  0x75   : > { %p801_p5 = pneg %p800_p7  ;;  %p807_p0 = por %p806_p9, %p805_p8 }
  0x77   : > { %p808_p1 = pnand %p807_p0, %p801_p5 }
  0x79   : > { %811 = shalt.err (!%p808_p1)
}
  0x7a   : > { %s812_s30 = scalar_lea.hbm %s1225_s15, 16  ;;  %s816_s13 = scalar_lea.hbm %s1398_s3, 32 }
  0x7b   : > { %p813_p11 = scmp.ne.s32.totalorder %s1225_s15, %s812_s30  ;;  %p817_p4 = scmp.lt.u32.totalorder %s1225_s15, %s1398_s3 }
  0x7c   : > { %p818_p10 = scmp.lt.u32.totalorder %s816_s13, %s812_s30  ;;  %p820_p6 = scmp.lt.u32.totalorder %s812_s30, %s1225_s15 }
  0x7d   : > { %p814_p12 = pnand %p813_p11, %p1435_p13 }
  0x7e   : > { %p819_p3 = por %p818_p10, %p817_p4 }
  0x7f   : > { %p815_p2 = pneg %p814_p12 }
  0x80   : > { %p821_p7 = por %p820_p6, %p819_p3 }
  0x82   : > { %p822_p5 = pnand %p821_p7, %p815_p2 }
  0x84   : > { %825 = shalt.err (!%p822_p5)
}
  0x85   : > { %672 = dma.vmem_to_hbm [thread:$0]  (%p1435_p13), %s1201_s7, 16, %s1225_s15, %s1253_s14  }
  0x86   : > { %s1436_s17 = scalar_lea.vmem [#allocation11], %s1182_s18  ;;  %s1437_s0 = scalar_lea.vmem [#allocation10], %s1182_s18 }
  0x87   : > { %365 = vst [vmem:[%s1436_s17] sm:$0x1] %v364_v32  ;;  %357 = vst [vmem:[%s1437_s0] sm:$0x1] %v356_v33  ;;  %s375_s1 = scalar_lea.sflag [#allocation4], %s1182_s18  ;;  %s826_s30 = scalar_lea.vmem %s1216_s11, 16 }
  0x88   : > { %p827_p8 = scmp.ne.s32.totalorder %s1216_s11, %s826_s30  ;;  %s993_s26 = smov [#allocation7]  }
  0x89   : > { %s830_s8 = sshll.u32 %s993_s26, 4  ;;  %s831_s8 = int_to_ptr.vmem [resolvable:$false] %s830_s8 }
  0x8a   : > { %p828_p9 = pnand %p827_p8, %p1435_p13  ;;  %s832_s13 = scalar_lea.vmem %s831_s8, 32 }
  0x8b   : > { %p833_p1 = scmp.lt.s32.totalorder %s1216_s11, %s831_s8  ;;  %p834_p11 = scmp.lt.s32.totalorder %s832_s13, %s826_s30 }
  0x8c   : > { %p829_p0 = pneg %p828_p9 }
  0x8d   : > { %p835_p12 = por %p834_p11, %p833_p1 }
  0x8f   : > { %p836_p2 = pnand %p835_p12, %p829_p0 }
  0x91   : > { %839 = shalt.err (!%p836_p2)
}
  0x92   : > { %s840_s7 = scalar_lea.hbm %s1235_s19, 16  ;;  %s844_s27 = scalar_lea.hbm %s1397_s2, 32 }
  0x93   : > { %p841_p4 = scmp.ne.s32.totalorder %s1235_s19, %s840_s7  ;;  %p845_p6 = scmp.lt.u32.totalorder %s1235_s19, %s1397_s2 }
  0x94   : > { %p846_p7 = scmp.lt.u32.totalorder %s844_s27, %s840_s7  ;;  %p848_p8 = scmp.lt.u32.totalorder %s840_s7, %s1235_s19 }
  0x95   : > { %p842_p10 = pnand %p841_p4, %p1435_p13 }
  0x96   : > { %p847_p5 = por %p846_p7, %p845_p6 }
  0x97   : > { %p843_p3 = pneg %p842_p10 }
  0x98   : > { %p849_p9 = por %p848_p8, %p847_p5 }
  0x9a   : > { %p850_p0 = pnand %p849_p9, %p843_p3 }
  0x9c   : > { %853 = shalt.err (!%p850_p0)
}
  0x9d   : > { %671 = dma.vmem_to_hbm [thread:$0]  (%p1435_p13), %s1216_s11, 16, %s1235_s19, %s375_s1  }
  0x9e   : > { %s1438_s30 = scalar_lea.vmem [#allocation13], %s1182_s18  ;;  %s1439_s26 = sand.u32 1, %s1053_s25  }
  0x9f   : > { %373 = vst [vmem:[%s1438_s30] sm:$0x1] %v372_v34  ;;  %s1307_s8 = scalar_lea.sflag [#allocation12], %s1439_s26  ;;  %s854_s13 = scalar_lea.vmem %s1214_s16, 16 }
  0xa0   : > { %p855_p1 = scmp.ne.s32.totalorder %s1214_s16, %s854_s13  ;;  %s994_s7 = smov [#allocation11]  }
  0xa1   : > { %s858_s15 = sshll.u32 %s994_s7, 4  ;;  %s859_s15 = int_to_ptr.vmem [resolvable:$false] %s858_s15 }
  0xa2   : > { %p856_p11 = pnand %p855_p1, %p1435_p13  ;;  %s860_s28 = scalar_lea.vmem %s859_s15, 32 }
  0xa3   : > { %p861_p2 = scmp.lt.s32.totalorder %s1214_s16, %s859_s15  ;;  %p862_p4 = scmp.lt.s32.totalorder %s860_s28, %s854_s13 }
  0xa4   : > { %p857_p12 = pneg %p856_p11 }
  0xa5   : > { %p863_p10 = por %p862_p4, %p861_p2 }
  0xa7   : > { %p864_p3 = pnand %p863_p10, %p857_p12 }
  0xa9   : > { %867 = shalt.err (!%p864_p3)
}
  0xaa   : > { %s868_s25 = scalar_lea.hbm %s1230_s20, 16  ;;  %s872_s19 = scalar_lea.hbm %s1400_s5, 32 }
  0xab   : > { %p869_p6 = scmp.ne.s32.totalorder %s1230_s20, %s868_s25  ;;  %p873_p8 = scmp.lt.u32.totalorder %s1230_s20, %s1400_s5 }
  0xac   : > { %p874_p9 = scmp.lt.u32.totalorder %s872_s19, %s868_s25  ;;  %p876_p1 = scmp.lt.u32.totalorder %s868_s25, %s1230_s20 }
  0xad   : > { %p870_p7 = pnand %p869_p6, %p1435_p13 }
  0xae   : > { %p875_p0 = por %p874_p9, %p873_p8 }
  0xaf   : > { %p871_p5 = pneg %p870_p7 }
  0xb0   : > { %p877_p11 = por %p876_p1, %p875_p0 }
  0xb2   : > { %p878_p12 = pnand %p877_p11, %p871_p5 }
  0xb4   : > { %881 = shalt.err (!%p878_p12)
}
  0xb5   : > { %674 = dma.vmem_to_hbm [thread:$0]  (%p1435_p13), %s1214_s16, 16, %s1230_s20, %s1307_s8  }
  0xb6   : > { %s882_s17 = scalar_lea.vmem %s1218_s29, 16  ;;  %s995_s0 = smov [#allocation10]  }
  0xb7   : > { %p883_p2 = scmp.ne.s32.totalorder %s1218_s29, %s882_s17  ;;  %s886_s30 = sshll.u32 %s995_s0, 4  ;;  %s887_s30 = int_to_ptr.vmem [resolvable:$false] %s886_s30 }
  0xb8   : > { %s888_s26 = scalar_lea.vmem %s887_s30, 32  ;;  %p889_p3 = scmp.lt.s32.totalorder %s1218_s29, %s887_s30 }
  0xb9   : > { %p884_p4 = pnand %p883_p2, %p1435_p13  ;;  %p890_p6 = scmp.lt.s32.totalorder %s888_s26, %s882_s17 }
  0xbb   : > { %p885_p10 = pneg %p884_p4  ;;  %p891_p7 = por %p890_p6, %p889_p3 }
  0xbd   : > { %p892_p5 = pnand %p891_p7, %p885_p10 }
  0xbf   : > { %895 = shalt.err (!%p892_p5)
}
  0xc0   : > { %s896_s16 = scalar_lea.hbm %s1244_s23, 16  ;;  %s900_s7 = scalar_lea.hbm %s1399_s4, 32 }
  0xc1   : > { %p897_p8 = scmp.ne.s32.totalorder %s1244_s23, %s896_s16  ;;  %p901_p1 = scmp.lt.u32.totalorder %s1244_s23, %s1399_s4 }
  0xc2   : > { %p902_p11 = scmp.lt.u32.totalorder %s900_s7, %s896_s16  ;;  %p904_p2 = scmp.lt.u32.totalorder %s896_s16, %s1244_s23 }
  0xc3   : > { %p898_p9 = pnand %p897_p8, %p1435_p13 }
  0xc4   : > { %p903_p12 = por %p902_p11, %p901_p1 }
  0xc5   : > { %p899_p0 = pneg %p898_p9 }
  0xc6   : > { %p905_p4 = por %p904_p2, %p903_p12 }
  0xc8   : > { %p906_p10 = pnand %p905_p4, %p899_p0 }
  0xca   : > { %909 = shalt.err (!%p906_p10)
}
  0xcb   : > { %673 = dma.vmem_to_hbm [thread:$0]  (%p1435_p13), %s1218_s29, 16, %s1244_s23, %s1253_s14  }
  0xcc   : > { %s910_s25 = scalar_lea.vmem %s1220_s12, 16  ;;  %s996_s18 = smov [#allocation13]  }
  0xcd   : > { %p911_p3 = scmp.ne.s32.totalorder %s1220_s12, %s910_s25  ;;  %s914_s11 = sshll.u32 %s996_s18, 4  ;;  %s915_s11 = int_to_ptr.vmem [resolvable:$false] %s914_s11 }
  0xce   : > { %s916_s19 = scalar_lea.vmem %s915_s11, 32  ;;  %p917_p5 = scmp.lt.s32.totalorder %s1220_s12, %s915_s11 }
  0xcf   : > { %p912_p6 = pnand %p911_p3, %p1435_p13  ;;  %p918_p8 = scmp.lt.s32.totalorder %s916_s19, %s910_s25 }
  0xd1   : > { %p913_p7 = pneg %p912_p6  ;;  %p919_p9 = por %p918_p8, %p917_p5 }
  0xd3   : > { %p920_p0 = pnand %p919_p9, %p913_p7 }
  0xd5   : > { %923 = shalt.err (!%p920_p0)
}
  0xd6   : > { %s924_s23 = scalar_lea.hbm %s1249_s22, 16  ;;  %s928_s1 = scalar_lea.hbm %s1401_s6, 32 }
  0xd7   : > { %p925_p1 = scmp.ne.s32.totalorder %s1249_s22, %s924_s23  ;;  %p929_p2 = scmp.lt.u32.totalorder %s1249_s22, %s1401_s6 }
  0xd8   : > { %p930_p4 = scmp.lt.u32.totalorder %s928_s1, %s924_s23  ;;  %p932_p3 = scmp.lt.u32.totalorder %s924_s23, %s1249_s22 }
  0xd9   : > { %p926_p11 = pnand %p925_p1, %p1435_p13 }
  0xda   : > { %p931_p10 = por %p930_p4, %p929_p2 }
  0xdb   : > { %p927_p12 = pneg %p926_p11 }
  0xdc   : > { %p933_p6 = por %p932_p3, %p931_p10 }
  0xde   : > { %p934_p7 = pnand %p933_p6, %p927_p12 }
  0xe0   : > { %937 = shalt.err (!%p934_p7)
}
  0xe1   : > { %675 = dma.vmem_to_hbm [thread:$0]  (%p1435_p13), %s1220_s12, 16, %s1249_s22, %s1307_s8  }
  0xe2 PF: > { %s467_s0 = sand.u32 1, %s976_s21   ;;  %p1440_p5 = scmp.ne.s32.totalorder %s1423_s10, 0 }
  0xe3   : > { %p1441_p8 = scmp.ge.s32.totalorder %s988_s24, 2  ;;  %s468_s30 = scalar_lea.sflag [#allocation4], %s467_s0 }
  0xe5   : > { %p689_p9 = pnand %p1441_p8, %p1440_p5 }
  0xe7   : > { %963 = dma.done.wait (!%p689_p9), %s468_s30, 16  }
  0xe8   : > { %965 = vsyncadd (!%p689_p9), %s468_s30, 4294967280  ;;  %s1442_s26 = sadd.s32 4294967294, %s988_s24  }
  0xe9   : > { %s475_s16 = sand.u32 1, %s1442_s26  }
  0xea   : > { %s476_s20 = scalar_lea.sflag [#allocation9], %s475_s16 }
  0xeb   : > { %967 = dma.done.wait (!%p689_p9), %s476_s20, 32  }
  0xec   : > { %969 = vsyncadd (!%p689_p9), %s476_s20, 4294967264  ;;  %s492_s9 = scalar_lea.sflag [#allocation12], %s475_s16 }
  0xed   : > { %971 = dma.done.wait (!%p689_p9), %s492_s9, 32  }
  0xee   : > { %973 = vsyncadd (!%p689_p9), %s492_s9, 4294967264  ;;  %s1443_s24 = sld [smem:[#allocation21_spill]]  ;;  %s1444_s21 = sld [smem:[#allocation19_spill]] }
  0xef   : > { %s1445_s22 = sld [smem:[#allocation20_spill]]  ;;  %s1446_s23 = sld [smem:[#allocation22_spill]] }
  0xf4   : > { %p29_p13 = scmp.ge.s32.totalorder %s1443_s24, 4  }
  0xf6   :  { %31 = sbr.rel (!%p29_p13) target bundleno = 14 (0xe), region = 150 }
  0xfd   :  { %504 = vsyncpa [#allocation3], 1 }
  0xfe   :  { %506 = vsyncpa [#allocation3 + $0x1], 1 }
  0xff   :  { %507 = vsyncpa [#allocation6], 1 }
 0x100   :  { %509 = vsyncpa [#allocation6 + $0x1], 1 }
 0x101   :  { %510 = vsyncpa [#allocation4], 1 }
 0x102   :  { %512 = vsyncpa [#allocation4 + $0x1], 1 }
 0x103   :  { %513 = vsyncpa [#allocation9], 1 }
 0x104   :  { %515 = vsyncpa [#allocation9 + $0x1], 1 }
 0x105   :  { %516 = vsyncpa [#allocation12], 1 }
 0x106   :  { %518 = vsyncpa [#allocation12 + $0x1], 1 }

</bundles_post_ra>
